<compile_context>
chip_gen: v7x
topology: tpu7x:2x2x1
jax: 0.10.0
libtpu: 0.0.40
codegen_flags: <defaults>
</compile_context>

<pallas_src>
import functools

import jax
import jax.numpy as jnp
from jax import lax
from jax.experimental import pallas as pl
from jax.experimental.pallas import tpu as pltpu


def _triplet_loss_kernel(feat_r_ref, feat_c_ref, sq_r_ref, half_sq_c_ref,
                         lab_a_ref, lab_c_ref, out_ref,
                         max_pos_ref, min_neg_ref, *, margin):
    j = pl.program_id(1)

    @pl.when(j == 0)
    def _init():
        max_pos_ref[...] = jnp.full_like(max_pos_ref, -jnp.inf)
        min_neg_ref[...] = jnp.full_like(min_neg_ref, jnp.inf)

    # Gram tile on the MXU: contracting dims (1,1) -> no materialized transpose,
    # native-dtype operands, f32 accumulation.
    gram = lax.dot_general(
        feat_r_ref[...], feat_c_ref[...],
        dimension_numbers=(((1,), (1,)), ((), ())),
        preferred_element_type=jnp.float32)                    # [TM, TN]

    # Mining statistic: for a fixed anchor row, argmax/argmin over columns of
    #   d^2 = sq_r + sq_c - 2*gram
    # equals argmax/argmin of (sq_c/2 - gram) (sq_r constant per row, scaling by 2
    # monotone). d^2 is reconstructed only on the mined [TM,1] vectors at finalize.
    stat = half_sq_c_ref[...] - gram                           # [TM, TN] (bcast [1,TN])

    is_pos = lab_a_ref[...] == lab_c_ref[...]                  # [TM, TN] bool

    neg_inf = jnp.float32(-jnp.inf)
    pos_inf = jnp.float32(jnp.inf)
    tile_max_pos = jnp.max(jnp.where(is_pos, stat, neg_inf), axis=1, keepdims=True)
    tile_min_neg = jnp.min(jnp.where(is_pos, pos_inf, stat), axis=1, keepdims=True)

    max_pos_ref[...] = jnp.maximum(max_pos_ref[...], tile_max_pos)
    min_neg_ref[...] = jnp.minimum(min_neg_ref[...], tile_min_neg)

    @pl.when(j == pl.num_programs(1) - 1)
    def _finalize():
        sq_r = sq_r_ref[...]                                   # [TM, 1] f32
        # clamp(1e-12) + sqrt only on the two mined [TM,1] vectors (monotone, so mining
        # over the statistic is exactly equivalent to mining over clamped distances).
        d_ap = jnp.sqrt(jnp.maximum(2.0 * max_pos_ref[...] + sq_r, 1e-12))
        d_an = jnp.sqrt(jnp.maximum(2.0 * min_neg_ref[...] + sq_r, 1e-12))
        if margin is not None:
            # nn.MarginRankingLoss(margin)(d_an, d_ap, y=1), per-anchor term
            per = jnp.maximum(d_ap - d_an + jnp.float32(margin), 0.0)
        else:
            # nn.SoftMarginLoss()(d_an - d_ap, y=1) = softplus(d_ap - d_an), stable form
            z = d_ap - d_an
            per = jnp.maximum(z, 0.0) + jnp.log1p(jnp.exp(-jnp.abs(z)))
        # lane-dense [1, TM] store (single small XLU relayout once per row tile)
        out_ref[...] = per.T


def _tpu_generation():
    try:
        kind = jax.devices()[0].device_kind.lower()
    except Exception:
        return "unknown"
    for tag in ("v5", "v6", "v7"):
        if tag in kind:
            return tag
    return "unknown"


def _pick_tiles(n, d, feat_bytes):
    """Generation-aware MXU-friendly tiles.

    v5e : modest 128-aligned tiles, ~12 MiB budget (16 MiB scoped default).
    v6e : large row tiles (target 1024) to hide the column-stream DMA, ~24 MiB budget,
          raised vmem limit (128 MiB physical).
    v7x : 64 MiB physical VMEM -> conservative budget; TM capped at N/2 so the
          'parallel' row axis keeps both TensorCores busy.
    """
    gen = _tpu_generation()
    if gen == "v5":
        budget, vmem_limit = 12 << 20, 32 << 20
        tm_cands = (512, 384, 256, 128, 64, 32, 16, 8)
        max_tm = n
    elif gen == "v7":
        budget, vmem_limit = 22 << 20, 40 << 20
        tm_cands = (1024, 768, 512, 256, 128, 64, 32, 16, 8)
        max_tm = n // 2 if n >= 256 else n
    else:  # v6e or unknown
        budget, vmem_limit = 24 << 20, 40 << 20
        tm_cands = (1024, 768, 512, 256, 128, 64, 32, 16, 8)
        max_tm = n
    tn_cands = (512, 256, 128)

    def pick(cands, limit):
        for t in cands:
            if t <= limit and n % t == 0:
                return t
        return n  # block == full array dim is always a legal block shape

    tm = pick(tm_cands, max_tm)
    tn = pick(tn_cands, n)

    def vmem(tm_, tn_):
        # double-buffered feature tiles + ~4 f32 [TM,TN] temporaries + small vectors
        return (2 * (tm_ + tn_) * d * feat_bytes
                + 4 * tm_ * tn_ * 4
                + 8 * (tm_ + tn_) * 4)

    while vmem(tm, tn) > budget and tm > 128 and tm % 2 == 0 and n % (tm // 2) == 0:
        tm //= 2
    while vmem(tm, tn) > budget and tn > 128 and tn % 2 == 0 and n % (tn // 2) == 0:
        tn //= 2
    return tm, tn, vmem_limit


def triplet_loss(global_feat, labels, *, margin=0.3, normalize_feature=False):
    """Pallas TripletLoss forward (matches the PyTorch module with reduction='mean').

    global_feat: [N, D] float array (f32 or bf16)
    labels:      [N] integer array (equal #samples per class, as in the reference)
    margin:      float -> MarginRankingLoss; None -> SoftMarginLoss
    """
    if normalize_feature:
        global_feat = global_feat / (
            jnp.linalg.norm(global_feat, ord=2, axis=-1, keepdims=True) + 1e-12
        )
    n, d = global_feat.shape
    labels = labels.astype(jnp.int32)
    lab_col = labels.reshape(n, 1)   # anchor labels (per-row)
    lab_row = labels.reshape(1, n)   # comparison labels (per-column)

    # Per-sample squared norms computed once here (f32) instead of per tile in-kernel.
    feat_f32 = global_feat.astype(jnp.float32)
    sq = jnp.sum(feat_f32 * feat_f32, axis=1)
    sq_r = sq.reshape(n, 1)                 # anchor-row squared norms   [N, 1]
    half_sq_c = (0.5 * sq).reshape(1, n)    # column half squared norms  [1, N]

    feat_bytes = global_feat.dtype.itemsize
    tm, tn, vmem_limit = _pick_tiles(n, d, feat_bytes)
    grid = (n // tm, n // tn)

    kernel = functools.partial(_triplet_loss_kernel, margin=margin)

    cost = pl.CostEstimate(
        flops=int(2 * n * n * d + 6 * n * n),
        transcendentals=int(2 * n),
        bytes_accessed=int((1 + grid[0]) * n * d * feat_bytes
                           + grid[0] * 2 * n * 4      # column norms + labels streams
                           + 3 * n * 4),              # row norms, row labels, output
    )

    per_anchor = pl.pallas_call(
        kernel,
        out_shape=jax.ShapeDtypeStruct((1, n), jnp.float32),
        grid_spec=pltpu.PrefetchScalarGridSpec(
            num_scalar_prefetch=0,
            grid=grid,
            in_specs=[
                pl.BlockSpec((tm, d), lambda i, j: (i, 0)),   # anchor feature rows
                pl.BlockSpec((tn, d), lambda i, j: (j, 0)),   # comparison feature rows
                pl.BlockSpec((tm, 1), lambda i, j: (i, 0)),   # anchor sq norms   [TM,1]
                pl.BlockSpec((1, tn), lambda i, j: (0, j)),   # col half sq norms [1,TN]
                pl.BlockSpec((tm, 1), lambda i, j: (i, 0)),   # anchor labels     [TM,1]
                pl.BlockSpec((1, tn), lambda i, j: (0, j)),   # column labels     [1,TN]
            ],
            out_specs=pl.BlockSpec((1, tm), lambda i, j: (0, i)),
            scratch_shapes=[
                pltpu.VMEM((tm, 1), jnp.float32),   # running max positive statistic
                pltpu.VMEM((tm, 1), jnp.float32),   # running min negative statistic
            ],
        ),
        compiler_params=pltpu.CompilerParams(
            dimension_semantics=("parallel", "arbitrary"),
            vmem_limit_bytes=vmem_limit,
        ),
        cost_estimate=cost,
    )(global_feat, global_feat, sq_r, half_sq_c, lab_col, lab_row)

    return jnp.mean(per_anchor)


def _reference_triplet_loss(feat, labels, margin, normalize_feature):
    # pure-JAX reference mirroring the PyTorch module (for correctness check)
    if normalize_feature:
        feat = feat / (jnp.linalg.norm(feat, ord=2, axis=-1, keepdims=True) + 1e-12)
    diff = feat[:, None, :].astype(jnp.float32) - feat[None, :, :].astype(jnp.float32)
    dist = jnp.sqrt(jnp.clip(jnp.sum(diff * diff, axis=-1), 1e-12, None))
    is_pos = labels[:, None] == labels[None, :]
    d_ap = jnp.max(jnp.where(is_pos, dist, -jnp.inf), axis=1)
    d_an = jnp.min(jnp.where(is_pos, jnp.inf, dist), axis=1)
    if margin is not None:
        return jnp.mean(jnp.maximum(d_ap - d_an + margin, 0.0))
    z = d_ap - d_an
    return jnp.mean(jnp.maximum(z, 0.0) + jnp.log1p(jnp.exp(-jnp.abs(z))))


if __name__ == "__main__":
    # Small deterministic example: N=8 samples, D=32 features, 4 classes x 2 samples.
    # NOTE: like the PyTorch module, assumes every class has at least one positive and
    # one negative in the batch.
    key = jax.random.PRNGKey(0)
    N, D = 8, 32
    feat = jax.random.normal(key, (N, D), dtype=jnp.float32)
    labels = jnp.array([0, 0, 1, 1, 2, 2, 3, 3], dtype=jnp.int32)

    # MarginRankingLoss path
    loss = triplet_loss(feat, labels, margin=0.3, normalize_feature=False)
    jax.block_until_ready(loss)
    ref = _reference_triplet_loss(feat, labels, 0.3, False)
    assert loss.shape == ()
    assert bool(jnp.isfinite(loss))
    assert abs(float(loss) - float(ref)) < 1e-4, (float(loss), float(ref))

    # SoftMarginLoss path (margin=None), numerically-stable softplus, normalized feats
    loss_soft = triplet_loss(feat, labels, margin=None, normalize_feature=True)
    jax.block_until_ready(loss_soft)
    ref_soft = _reference_triplet_loss(feat, labels, None, True)
    assert bool(jnp.isfinite(loss_soft))
    assert abs(float(loss_soft) - float(ref_soft)) < 1e-4, (float(loss_soft), float(ref_soft))

    print("KERNEL_OK")
</pallas_src>

<mosaic_0001>
module attributes {stable_mosaic.version = 11 : i64} {
  func.func @_triplet_loss_kernel(%arg0: i32, %arg1: i32, %arg2: memref<8x32xf32, #tpu.memory_space<vmem>>, %arg3: memref<8x32xf32, #tpu.memory_space<vmem>>, %arg4: memref<8x1xf32, #tpu.memory_space<vmem>>, %arg5: memref<1x8xf32, #tpu.memory_space<vmem>>, %arg6: memref<8x1xi32, #tpu.memory_space<vmem>>, %arg7: memref<1x8xi32, #tpu.memory_space<vmem>>, %arg8: memref<1x8xf32, #tpu.memory_space<vmem>>, %arg9: memref<8x1xf32, #tpu.memory_space<vmem>>, %arg10: memref<8x1xf32, #tpu.memory_space<vmem>>) attributes {dimension_semantics = [#tpu.dimension_semantics<parallel>, #tpu.dimension_semantics<arbitrary>], iteration_bounds = array<i64: 1, 1>, scalar_prefetch = 0 : i64, scratch_operands = 2 : i64, tpu.core_type = #tpu.core_type<tc>, window_params = [{transform_indices = @transform_0, window_bounds = array<i64: 8, 32>}, {transform_indices = @transform_1, window_bounds = array<i64: 8, 32>}, {transform_indices = @transform_2, window_bounds = array<i64: 8, 1>}, {transform_indices = @transform_3, window_bounds = array<i64: 1, 8>}, {transform_indices = @transform_4, window_bounds = array<i64: 8, 1>}, {transform_indices = @transform_5, window_bounds = array<i64: 1, 8>}, {transform_indices = @transform_6, window_bounds = array<i64: 1, 8>}]} {
    %c0_i32 = arith.constant 0 : i32
    %0 = arith.cmpi eq, %arg1, %c0_i32 : i32
    %1 = arith.extui %0 : i1 to i32
    %c0_i32_0 = arith.constant 0 : i32
    %2 = arith.cmpi ne, %1, %c0_i32_0 : i32
    scf.if %2 {
      %cst_24 = arith.constant 0xFF800000 : f32
      %31 = vector.broadcast %cst_24 : f32 to vector<8x1xf32>
      %c0_25 = arith.constant 0 : index
      %c0_26 = arith.constant 0 : index
      %32 = vector.load %arg9[%c0_25, %c0_26] : memref<8x1xf32, #tpu.memory_space<vmem>>, vector<8x1xf32>
      tpu.vector_store %arg9[%c0_25, %c0_26], %31 {strides = array<i32>} : memref<8x1xf32, #tpu.memory_space<vmem>>, vector<8x1xf32>,
      %cst_27 = arith.constant 0x7F800000 : f32
      %33 = vector.broadcast %cst_27 : f32 to vector<8x1xf32>
      %c0_28 = arith.constant 0 : index
      %c0_29 = arith.constant 0 : index
      %34 = vector.load %arg10[%c0_28, %c0_29] : memref<8x1xf32, #tpu.memory_space<vmem>>, vector<8x1xf32>
      tpu.vector_store %arg10[%c0_28, %c0_29], %33 {strides = array<i32>} : memref<8x1xf32, #tpu.memory_space<vmem>>, vector<8x1xf32>,
    } else {
    }
    %c0 = arith.constant 0 : index
    %c0_1 = arith.constant 0 : index
    %3 = vector.load %arg2[%c0, %c0_1] : memref<8x32xf32, #tpu.memory_space<vmem>>, vector<8x32xf32>
    %c0_2 = arith.constant 0 : index
    %c0_3 = arith.constant 0 : index
    %4 = vector.load %arg3[%c0_2, %c0_3] : memref<8x32xf32, #tpu.memory_space<vmem>>, vector<8x32xf32>
    %cst = arith.constant dense<0.000000e+00> : vector<8x8xf32>
    %5 = tpu.matmul %3, %4, %cst {dimension_numbers = #tpu.dot_dimension_numbers<[1], [1], [0], [0], [0, 0, 1, 0], [], []>} : vector<8x32xf32>, vector<8x32xf32>, vector<8x8xf32> -> vector<8x8xf32>
    %c0_4 = arith.constant 0 : index
    %c0_5 = arith.constant 0 : index
    %6 = vector.load %arg5[%c0_4, %c0_5] : memref<1x8xf32, #tpu.memory_space<vmem>>, vector<1x8xf32>
    %7 = vector.broadcast %6 : vector<1x8xf32> to vector<8x8xf32>
    %8 = arith.subf %7, %5 : vector<8x8xf32>
    %c0_6 = arith.constant 0 : index
    %c0_7 = arith.constant 0 : index
    %9 = vector.load %arg6[%c0_6, %c0_7] : memref<8x1xi32, #tpu.memory_space<vmem>>, vector<8x1xi32>
    %c0_8 = arith.constant 0 : index
    %c0_9 = arith.constant 0 : index
    %10 = vector.load %arg7[%c0_8, %c0_9] : memref<1x8xi32, #tpu.memory_space<vmem>>, vector<1x8xi32>
    %11 = vector.broadcast %9 : vector<8x1xi32> to vector<8x8xi32>
    %12 = vector.broadcast %10 : vector<1x8xi32> to vector<8x8xi32>
    %13 = arith.cmpi eq, %11, %12 : vector<8x8xi32>
    %cst_10 = arith.constant 0xFF800000 : f32
    %14 = vector.broadcast %cst_10 : f32 to vector<8x8xf32>
    %15 = arith.select %13, %8, %14 : vector<8x8xi1>, vector<8x8xf32>
    %cst_11 = arith.constant dense<0xFF800000> : vector<8xf32>
    %16 = vector.multi_reduction <maximumf>, %15, %cst_11 [1] : vector<8x8xf32> to vector<8xf32>
    %17 = vector.shape_cast %16 : vector<8xf32> to vector<8x1xf32>
    %cst_12 = arith.constant 0x7F800000 : f32
    %18 = vector.broadcast %cst_12 : f32 to vector<8x8xf32>
    %19 = arith.select %13, %18, %8 : vector<8x8xi1>, vector<8x8xf32>
    %cst_13 = arith.constant dense<0x7F800000> : vector<8xf32>
    %20 = vector.multi_reduction <minimumf>, %19, %cst_13 [1] : vector<8x8xf32> to vector<8xf32>
    %21 = vector.shape_cast %20 : vector<8xf32> to vector<8x1xf32>
    %c0_14 = arith.constant 0 : index
    %c0_15 = arith.constant 0 : index
    %22 = vector.load %arg9[%c0_14, %c0_15] : memref<8x1xf32, #tpu.memory_space<vmem>>, vector<8x1xf32>
    %23 = arith.maximumf %22, %17 : vector<8x1xf32>
    %c0_16 = arith.constant 0 : index
    %c0_17 = arith.constant 0 : index
    %24 = vector.load %arg9[%c0_16, %c0_17] : memref<8x1xf32, #tpu.memory_space<vmem>>, vector<8x1xf32>
    tpu.vector_store %arg9[%c0_16, %c0_17], %23 {strides = array<i32>} : memref<8x1xf32, #tpu.memory_space<vmem>>, vector<8x1xf32>,
    %c0_18 = arith.constant 0 : index
    %c0_19 = arith.constant 0 : index
    %25 = vector.load %arg10[%c0_18, %c0_19] : memref<8x1xf32, #tpu.memory_space<vmem>>, vector<8x1xf32>
    %26 = arith.minimumf %25, %21 : vector<8x1xf32>
    %c0_20 = arith.constant 0 : index
    %c0_21 = arith.constant 0 : index
    %27 = vector.load %arg10[%c0_20, %c0_21] : memref<8x1xf32, #tpu.memory_space<vmem>>, vector<8x1xf32>
    tpu.vector_store %arg10[%c0_20, %c0_21], %26 {strides = array<i32>} : memref<8x1xf32, #tpu.memory_space<vmem>>, vector<8x1xf32>,
    %c0_i32_22 = arith.constant 0 : i32
    %28 = arith.cmpi eq, %arg1, %c0_i32_22 : i32
    %29 = arith.extui %28 : i1 to i32
    %c0_i32_23 = arith.constant 0 : i32
    %30 = arith.cmpi ne, %29, %c0_i32_23 : i32
    scf.if %30 {
      %c0_24 = arith.constant 0 : index
      %c0_25 = arith.constant 0 : index
      %31 = vector.load %arg4[%c0_24, %c0_25] : memref<8x1xf32, #tpu.memory_space<vmem>>, vector<8x1xf32>
      %c0_26 = arith.constant 0 : index
      %c0_27 = arith.constant 0 : index
      %32 = vector.load %arg9[%c0_26, %c0_27] : memref<8x1xf32, #tpu.memory_space<vmem>>, vector<8x1xf32>
      %cst_28 = arith.constant 2.000000e+00 : f32
      %33 = vector.broadcast %cst_28 : f32 to vector<8x1xf32>
      %34 = arith.mulf %33, %32 : vector<8x1xf32>
      %35 = arith.addf %34, %31 : vector<8x1xf32>
      %cst_29 = arith.constant 9.99999996E-13 : f32
      %36 = vector.broadcast %cst_29 : f32 to vector<8x1xf32>
      %37 = arith.maximumf %35, %36 : vector<8x1xf32>
      %38 = math.sqrt %37 : vector<8x1xf32>
      %c0_30 = arith.constant 0 : index
      %c0_31 = arith.constant 0 : index
      %39 = vector.load %arg10[%c0_30, %c0_31] : memref<8x1xf32, #tpu.memory_space<vmem>>, vector<8x1xf32>
      %cst_32 = arith.constant 2.000000e+00 : f32
      %40 = vector.broadcast %cst_32 : f32 to vector<8x1xf32>
      %41 = arith.mulf %40, %39 : vector<8x1xf32>
      %42 = arith.addf %41, %31 : vector<8x1xf32>
      %cst_33 = arith.constant 9.99999996E-13 : f32
      %43 = vector.broadcast %cst_33 : f32 to vector<8x1xf32>
      %44 = arith.maximumf %42, %43 : vector<8x1xf32>
      %45 = math.sqrt %44 : vector<8x1xf32>
      %46 = arith.subf %38, %45 : vector<8x1xf32>
      %cst_34 = arith.constant 3.000000e-01 : f32
      %47 = vector.broadcast %cst_34 : f32 to vector<8x1xf32>
      %48 = arith.addf %46, %47 : vector<8x1xf32>
      %cst_35 = arith.constant 0.000000e+00 : f32
      %49 = vector.broadcast %cst_35 : f32 to vector<8x1xf32>
      %50 = arith.maximumf %48, %49 : vector<8x1xf32>
      %51 = tpu.transpose %50, [1, 0] : vector<8x1xf32> -> vector<1x8xf32>
      %c0_36 = arith.constant 0 : index
      %c0_37 = arith.constant 0 : index
      %52 = vector.load %arg8[%c0_36, %c0_37] : memref<1x8xf32, #tpu.memory_space<vmem>>, vector<1x8xf32>
      tpu.vector_store %arg8[%c0_36, %c0_37], %51 {strides = array<i32>} : memref<1x8xf32, #tpu.memory_space<vmem>>, vector<1x8xf32>,
    } else {
    }
    return
  }
  func.func @transform_0(%arg0: i32, %arg1: i32) -> (i32, i32) {
    %c0_i32 = arith.constant 0 : i32
    %c0_i32_0 = arith.constant 0 : i32
    return %arg0, %c0_i32 : i32, i32
  }
  func.func @transform_1(%arg0: i32, %arg1: i32) -> (i32, i32) {
    %c0_i32 = arith.constant 0 : i32
    %c0_i32_0 = arith.constant 0 : i32
    return %arg1, %c0_i32 : i32, i32
  }
  func.func @transform_2(%arg0: i32, %arg1: i32) -> (i32, i32) {
    %c0_i32 = arith.constant 0 : i32
    %c0_i32_0 = arith.constant 0 : i32
    return %arg0, %c0_i32 : i32, i32
  }
  func.func @transform_3(%arg0: i32, %arg1: i32) -> (i32, i32) {
    %c0_i32 = arith.constant 0 : i32
    %c0_i32_0 = arith.constant 0 : i32
    return %c0_i32, %arg1 : i32, i32
  }
  func.func @transform_4(%arg0: i32, %arg1: i32) -> (i32, i32) {
    %c0_i32 = arith.constant 0 : i32
    %c0_i32_0 = arith.constant 0 : i32
    return %arg0, %c0_i32 : i32, i32
  }
  func.func @transform_5(%arg0: i32, %arg1: i32) -> (i32, i32) {
    %c0_i32 = arith.constant 0 : i32
    %c0_i32_0 = arith.constant 0 : i32
    return %c0_i32, %arg1 : i32, i32
  }
  func.func @transform_6(%arg0: i32, %arg1: i32) -> (i32, i32) {
    %c0_i32 = arith.constant 0 : i32
    %c0_i32_0 = arith.constant 0 : i32
    return %c0_i32, %arg0 : i32, i32
  }
}

</mosaic_0001>

<bundles_post_ra>
// kernel: tpu_custom_call.1
= control target key start
LH: loop header
LB: loop body
LE: loop exit
PB: predicated region body
PF: predicated region fallthrough
CT: control target
= control target key end

     0   :  { %vm33_vm0 = vcmask 261120   ;;  %v267_v1 = vmov 0.0   ;;  %vm268_vm1 = vmmov 0   ;;  %s338_s0 = inlined_call_operand.vmem [shape: f32[8,32], index: 0, kind: input, shape index: {}]   ;;  %s339_s1 = inlined_call_operand.vmem [shape: f32[8,32], index: 1, kind: input, shape index: {}]   ;;  %s340_s2 = inlined_call_operand.vmem [shape: f32[8,1], index: 2, kind: input, shape index: {}]   ;;  %s341_s3 = inlined_call_operand.vmem [shape: f32[1,8], index: 3, kind: input, shape index: {}]   ;;  %s342_s4 = inlined_call_operand.vmem [shape: s32[8,1], index: 4, kind: input, shape index: {}]   ;;  %s343_s5 = inlined_call_operand.vmem [shape: s32[1,8], index: 5, kind: input, shape index: {}]   ;;  %s344_s6 = inlined_call_operand.hbm [shape: f32[1,8], index: 6, kind: output, shape index: {}]  }
   0x1   :  { %v32_v0 = vld [vmem:[%s339_s1] sm:$0xff]  ;;  %227 = vmatprep.subr.mxu0 %v267_v1  ;;  %229 = vmatprep.mubr.msk.f32.mxu0 %vm268_vm1, %v267_v1 }
   0x2   :  { %v118_v2 = vld [vmem:[%s342_s4] sm:$0xff] }
   0x3   :  { %11 = vsyncpa [#allocation5], 0  ;;  %228 = vmatpush3.xpose.msk.msra.mxu0 %vm33_vm0, %v32_v0  ;;  %v31_v3 = vld [vmem:[%s338_s0] sm:$0xff]  ;;  %v269_v4 = vmov 0   ;;  %vm129_vm3 = vcmask 64512   ;;  %vm28_vm4 = vcmask 7168  }
   0x4   :  { %238 = vset.pattern.permute.xlu0 %v269_v4  ;;  %v224_v5 = vld [vmem:[%s343_s5] ss:$0 sm:$0xff]  ;;  %v270_v15 = vmov inf   ;;  %v271_v16 = vmov -inf   ;;  %vm205_vm9 = vcmask 57344  }
   0x5   :  { %121 = vperm.xlu0 %238, %v118_v2   ;;  %v223_v7 = vld [vmem:[%s341_s3] ss:$0 sm:$0xff]  ;;  %30 = vst.msk [vmem:[#allocation3] sm:$0xff] %vm28_vm4, %v270_v15  ;;  %29 = vst.msk [vmem:[#allocation2] sm:$0xff] %vm28_vm4, %v271_v16 }
   0x6   :  { %230 = vmatmul.mubr.msk.f32.vlgmr.msra.gmra.mrb[0].mxu0 %vm33_vm0, %v31_v3  ;;  %v147_v23 = vld [vmem:[%s340_s2] sm:$0xff]  ;;  %s272_s2 = smov [#allocation4]  }
   0x7   :  { %s213_s4 = sshll.u32 %s272_s2, 4  ;;  %s214_s4 = int_to_ptr.vmem [resolvable:$true] %s213_s4 }
   0x8   :  { %s243_s5 = scalar_lea.vmem %s214_s4, 16  ;;  %s247_s30 = scalar_lea.vmem %s214_s4, 32 }
   0x9   :  { %p244_p0 = scmp.ne.s32.totalorder %s214_s4, %s243_s5  ;;  %p248_p1 = scmp.lt.s32.totalorder %s214_s4, %s214_s4 }
   0xa   :  { %p249_p2 = scmp.lt.s32.totalorder %s247_s30, %s243_s5 }
   0xc   :  { %v141_v17 = vld [vmem:[#allocation3] sm:$0xff]  ;;  %v137_v18 = vld [vmem:[#allocation2] sm:$0xff]  ;;  %p250_p3 = por %p249_p2, %p248_p1 }
   0xe   :  { %p251_p4 = pnand %p250_p3, %p244_p0 }
  0x84   :  { %v122_v6 = vpop.permute.xlu0 %121 }
  0x85   :  { %vm127_vm2 = vcmp.eq.s32.totalorder %v122_v6, %v224_v5 }
  0xd9   :  { %v106_v8 = vpop.f32.mrb[0].mxu0 }
  0xda   :  { %v117_v9 = vsub.f32 %v223_v7, %v106_v8  ;;  %v231_v10 = vpop.f32.mrb[1].mxu0 }
  0xdc   :  { %v133_v11 = vsel %vm127_vm2, inf, %v117_v9  ;;  %v128_v12 = vsel %vm127_vm2, %v117_v9, -inf }
  0xdd   :  { %v134_v13 = vsel %vm129_vm3, %v133_v11, inf  ;;  %v130_v14 = vsel %vm129_vm3, %v128_v12, -inf }
  0xde   :  { %135 = vmin.xlane.f32.xlu1 %v134_v13  ;;  %131 = vmax.xlane.f32.xlu0 %v130_v14 }
 0x16b   :  { %v136_v19 = vpop.xlane.xlu1 %135  ;;  %v132_v20 = vpop.xlane.xlu0 %131 }
 0x16c   :  { %v142_v21 = vmin.f32 %v141_v17, %v136_v19  ;;  %v138_v22 = vmax.f32 %v137_v18, %v132_v20 }
 0x16e   :  { %143 = vst.msk [vmem:[#allocation3] sm:$0xff] %vm28_vm4, %v142_v21  ;;  %140 = vst.msk [vmem:[#allocation2] sm:$0xff] %vm28_vm4, %v138_v22 }
 0x175   :  { %v148_v24 = vld [vmem:[#allocation2] sm:$0xff]  ;;  %v159_v25 = vld [vmem:[#allocation3] sm:$0xff] }
 0x176   :  { %v149_v26 = vmul.f32 2.0, %v148_v24  ;;  %v160_v27 = vmul.f32 2.0, %v159_v25 }
 0x178   :  { %v150_v28 = vadd.f32 %v149_v26, %v147_v23  ;;  %v161_v29 = vadd.f32 %v160_v27, %v147_v23 }
 0x17a   :  { %v151_v30 = vmax.f32 %v150_v28, 1e-12  ;;  %v162_v31 = vmax.f32 %v161_v29, 1e-12 }
 0x17c   :  { %239 = vrsqrt.f32 %v151_v30  ;;  %vm154_vm5 = vcmp.eq.f32.partialorder %v151_v30, inf  ;;  %v157_v35 = vand.u32 2147483648, %v151_v30  ;;  %vm156_vm6 = vcmp.eq.f32.partialorder %v151_v30, 0.0 }
 0x17d   :  { %241 = vrsqrt.f32 %v162_v31  ;;  %vm165_vm7 = vcmp.eq.f32.partialorder %v162_v31, inf  ;;  %v168_v38 = vand.u32 2147483648, %v162_v31  ;;  %vm167_vm8 = vcmp.eq.f32.partialorder %v162_v31, 0.0 }
 0x186   :  { %v240_v32 = vpop.eup %239 }
 0x187   :  { %v242_v33 = vpop.eup %241  ;;  %v153_v34 = vmul.f32 %v240_v32, %v151_v30 }
 0x188   :  { %v164_v36 = vmul.f32 %v242_v33, %v162_v31 }
 0x189   :  { %v155_v37 = vsel %vm154_vm5, %v151_v30, %v153_v34 }
 0x18a   :  { %v158_v39 = vsel %vm156_vm6, %v157_v35, %v155_v37  ;;  %v166_v40 = vsel %vm165_vm7, %v162_v31, %v164_v36 }
 0x18b   :  { %v169_v41 = vsel %vm167_vm8, %v168_v38, %v166_v40 }
 0x18c   :  { %v170_v42 = vsub.f32 %v158_v39, %v169_v41 }
 0x18e   :  { %v171_v43 = vadd.f32 0.3, %v170_v42 }
 0x190   :  { %v172_v44 = vmax.f32 %v171_v43, 0.0 }
 0x192   :  { %173 = vxpose.xlu1.b32.start.end [1/1] (short) (narrow) %v172_v44, 8 }
 0x212   :  { %v189_v45 = vpop.trf.xlu1 }
 0x213   :  { %206 = vst.msk [vmem:[#allocation4] sm:$0x1] %vm205_vm9, %v189_v45 }
 0x214   :  { %254 = shalt.err (!%p251_p4)
}
 0x215   :  { %s255_s9 = scalar_lea.hbm %s344_s6, 16 }
 0x216   :  { %p256_p5 = scmp.ne.s32.totalorder %s344_s6, %s255_s9  ;;  %p259_p6 = scmp.lt.u32.totalorder %s255_s9, %s344_s6 }
 0x218   :  { %p261_p7 = pnand %p259_p6, %p256_p5 }
 0x21a   :  { %264 = shalt.err (!%p261_p7)
}
 0x21b   :  { %216 = dma.vmem_to_hbm [thread:$0]  %s214_s4, 16, %s344_s6, [#allocation5]  }
 0x21c   :  { %265 = dma.done.wait [#allocation5], 16  }
 0x21d   :  { %266 = vsyncadd [#allocation5], 4294967280 }
 0x21e   :  { %220 = vsyncpa [#allocation5], 1 }

</bundles_post_ra>
